<compile_context>
chip_gen: v7x
topology: tpu7x:2x2x1
jax: 0.10.0
libtpu: 0.0.40
codegen_flags: <defaults>
</compile_context>

<pallas_src>
import jax
import jax.numpy as jnp
from jax.experimental import pallas as pl
from jax.experimental.pallas import tpu as pltpu

MAX_BOARD_SIZE = 9.0


def hidden_single_kernel(x_ref, pc_ref, w2_ref, w3_ref, out_ref):
    # x_ref: (4, TB) raw rows [row, col, value, board_size]; batch on lanes.
    x = x_ref[...]
    size = x[3:4, :]                                    # (1, TB)
    inv = pl.reciprocal(size - 1.0)                     # exact; keeps 1e-5 parity

    row_n = x[0:1, :] * inv                             # (1, TB)
    col_n = x[1:2, :] * inv
    val_n = (x[2:3, :] - 1.0) * inv
    size_n = size * (1.0 / MAX_BOARD_SIZE)

    pc = pc_ref[...]                                    # (128, 9)

    # Layer 1 (4 -> 128): four (128,1)x(1,TB) outer-product FMAs on the VPU.
    h = (pc[:, 0:1] * row_n
         + pc[:, 1:2] * col_n
         + pc[:, 2:3] * val_n
         + pc[:, 3:4] * size_n
         + pc[:, 4:5])
    h = jnp.maximum(h, 0.0)                             # (128, TB)

    # Layer 2 (128 -> 64): MXU, N = TB (lane-dense result).
    h = jnp.dot(w2_ref[...], h, preferred_element_type=jnp.float32) + pc[0:64, 5:6]
    h = jnp.maximum(h, 0.0)                             # (64, TB)

    # Layer 3 (64 -> 32): MXU.
    h = jnp.dot(w3_ref[...], h, preferred_element_type=jnp.float32) + pc[0:32, 6:7]
    h = jnp.maximum(h, 0.0)                             # (32, TB)

    # Layer 4 (32 -> 1): VPU multiply + sublane (XLU) reduction; no N=1 MXU op.
    logit = jnp.sum(h * pc[0:32, 7:8], axis=0, keepdims=True) + pc[0:1, 8:9]
    out_ref[...] = jax.nn.sigmoid(logit)                # (1, TB) lane-dense store


def init_params(key, max_board_size: int = 9):
    """Deterministic init matching PyTorch nn.Linear default (U[-1/sqrt(fan_in), +])."""
    dims = [4, 128, 64, 32, 1]
    params = {}
    keys = jax.random.split(key, 2 * (len(dims) - 1))
    for li, (din, dout) in enumerate(zip(dims[:-1], dims[1:])):
        bound = 1.0 / (din ** 0.5)
        w = jax.random.uniform(keys[2 * li], (din, dout), jnp.float32, -bound, bound)
        b = jax.random.uniform(keys[2 * li + 1], (1, dout), jnp.float32, -bound, bound)
        params[f"w{li + 1}"] = w
        params[f"b{li + 1}"] = b
    return params


def pack_params(params):
    """Pack the 8 weight/bias tensors into 3 transposed-layout VMEM slabs."""
    w1t = params["w1"].T                                           # (128, 4)
    b1 = params["b1"].reshape(128, 1)
    b2 = jnp.zeros((128, 1), jnp.float32).at[:64].set(params["b2"].reshape(64, 1))
    b3 = jnp.zeros((128, 1), jnp.float32).at[:32].set(params["b3"].reshape(32, 1))
    w4 = jnp.zeros((128, 1), jnp.float32).at[:32].set(params["w4"].reshape(32, 1))
    b4 = jnp.broadcast_to(params["b4"].reshape(1, 1), (128, 1))
    pc = jnp.concatenate([w1t, b1, b2, b3, w4, b4], axis=1)        # (128, 9)
    w2t = params["w2"].T                                           # (64, 128)
    w3t = params["w3"].T                                           # (32, 64)
    return pc, w2t, w3t


def _round_up(x, m):
    return ((x + m - 1) // m) * m


def hidden_single_forward(row, col, value, board, unit_candidates, board_size,
                          packed_params, *, block_b: int = 4096):
    """Pallas implementation of HiddenSingleModel.forward.

    row, col, value, board_size: (B,) integer or float arrays.
    board, unit_candidates: unused by the reference forward (kept for parity).
    packed_params: output of pack_params(params).
    Returns: (B,) float32 probabilities (matches .squeeze() for B > 1).
    """
    del board, unit_candidates  # unused, exactly as in the reference forward
    pc, w2t, w3t = packed_params
    B = row.shape[0]

    # Features in transposed layout: (4, B), batch on the lane axis.
    feats = jnp.stack([jnp.asarray(row, jnp.float32),
                       jnp.asarray(col, jnp.float32),
                       jnp.asarray(value, jnp.float32),
                       jnp.asarray(board_size, jnp.float32)], axis=0)     # (4, B)

    # Batch tiling: TB multiple of 128; ensure >= 2 grid blocks when possible
    # so the "parallel" axis shards across both v7x TensorCores.
    bp128 = _round_up(max(B, 1), 128)
    if bp128 >= 256:
        tb = min(block_b, _round_up((bp128 + 1) // 2, 128))
    else:
        tb = bp128                                                  # = 128
    bp = _round_up(bp128, tb)
    if bp != B:
        # Padded rows have board_size = 0 -> inv = -1: finite, discarded below.
        feats = jnp.pad(feats, ((0, 0), (0, bp - B)))

    out = pl.pallas_call(
        hidden_single_kernel,
        out_shape=jax.ShapeDtypeStruct((1, bp), jnp.float32),
        grid_spec=pltpu.PrefetchScalarGridSpec(
            num_scalar_prefetch=0,
            grid=(bp // tb,),
            in_specs=[
                pl.BlockSpec((4, tb), lambda i: (0, i)),      # features: tiled over batch
                pl.BlockSpec((128, 9), lambda i: (0, 0)),     # params: VMEM-resident
                pl.BlockSpec((64, 128), lambda i: (0, 0)),
                pl.BlockSpec((32, 64), lambda i: (0, 0)),
            ],
            out_specs=pl.BlockSpec((1, tb), lambda i: (0, i)),  # lane-dense output
        ),
        compiler_params=pltpu.CompilerParams(
            dimension_semantics=("parallel",)),                  # megacore sharding on v7x
    )(feats, pc, w2t, w3t)

    # TODO(synk): for B == 1, PyTorch .squeeze() yields a 0-d tensor; we return (1,).
    return out[0, :B]


def reference_forward(row, col, value, board_size, params):
    """Pure-JAX reference identical to the PyTorch forward (for verification)."""
    bs = board_size.astype(jnp.float32)
    row_n = row.astype(jnp.float32) / (bs - 1)
    col_n = col.astype(jnp.float32) / (bs - 1)
    val_n = (value.astype(jnp.float32) - 1) / (bs - 1)
    siz_n = bs / MAX_BOARD_SIZE
    feats = jnp.stack([row_n, col_n, val_n, siz_n], axis=1)
    h = jnp.maximum(feats @ params["w1"] + params["b1"], 0.0)
    h = jnp.maximum(h @ params["w2"] + params["b2"], 0.0)
    h = jnp.maximum(h @ params["w3"] + params["b3"], 0.0)
    return jax.nn.sigmoid(h @ params["w4"] + params["b4"]).reshape(-1)


if __name__ == "__main__":
    key = jax.random.PRNGKey(0)
    k_param, k_row, k_col, k_val = jax.random.split(key, 4)

    board_n = 9
    params = init_params(k_param, max_board_size=int(MAX_BOARD_SIZE))
    packed = pack_params(params)

    # --- small primary check (B = 8, single grid step, padded to 128 lanes) ---
    B = 8
    row = jax.random.randint(k_row, (B,), 0, board_n)
    col = jax.random.randint(k_col, (B,), 0, board_n)
    value = jax.random.randint(k_val, (B,), 1, board_n + 1)
    board_size = jnp.full((B,), board_n, dtype=jnp.int32)
    board = jnp.zeros((B, board_n, board_n), dtype=jnp.int32)               # unused
    unit_candidates = jnp.zeros((B, 3, board_n, board_n), dtype=jnp.int32)  # unused

    out = hidden_single_forward(row, col, value, board, unit_candidates,
                                board_size, packed)
    out = jax.block_until_ready(out)
    ref = reference_forward(row, col, value, board_size, params)
    assert out.shape == (B,)
    assert jnp.allclose(out, ref, atol=1e-5, rtol=1e-5), (out, ref)

    # --- secondary check exercising the 2-block grid + padding path ---
    B2 = 2000  # -> tb=1024, grid=(2,), 48 padded lanes discarded
    k2a, k2b, k2c = jax.random.split(jax.random.PRNGKey(1), 3)
    row2 = jax.random.randint(k2a, (B2,), 0, board_n)
    col2 = jax.random.randint(k2b, (B2,), 0, board_n)
    val2 = jax.random.randint(k2c, (B2,), 1, board_n + 1)
    bsz2 = jnp.full((B2,), board_n, dtype=jnp.int32)
    board2 = jnp.zeros((B2, board_n, board_n), dtype=jnp.int32)
    uc2 = jnp.zeros((B2, 3, board_n, board_n), dtype=jnp.int32)

    out2 = hidden_single_forward(row2, col2, val2, board2, uc2, bsz2, packed)
    out2 = jax.block_until_ready(out2)
    ref2 = reference_forward(row2, col2, val2, bsz2, params)
    assert out2.shape == (B2,)
    assert jnp.allclose(out2, ref2, atol=1e-5, rtol=1e-5)

    print("KERNEL_OK")
</pallas_src>

<mosaic_0001>
module attributes {stable_mosaic.version = 11 : i64} {
  func.func @hidden_single_kernel(%arg0: i32, %arg1: memref<4x128xf32, #tpu.memory_space<vmem>>, %arg2: memref<128x9xf32, #tpu.memory_space<vmem>>, %arg3: memref<64x128xf32, #tpu.memory_space<vmem>>, %arg4: memref<32x64xf32, #tpu.memory_space<vmem>>, %arg5: memref<1x128xf32, #tpu.memory_space<vmem>>) attributes {dimension_semantics = [#tpu.dimension_semantics<parallel>], iteration_bounds = array<i64: 1>, scalar_prefetch = 0 : i64, scratch_operands = 0 : i64, tpu.core_type = #tpu.core_type<tc>, window_params = [{transform_indices = @transform_0, window_bounds = array<i64: 4, 128>}, {pipeline_mode = #tpu.pipeline_mode<synchronous>, transform_indices = @transform_1, window_bounds = array<i64: 128, 9>}, {pipeline_mode = #tpu.pipeline_mode<synchronous>, transform_indices = @transform_2, window_bounds = array<i64: 64, 128>}, {pipeline_mode = #tpu.pipeline_mode<synchronous>, transform_indices = @transform_3, window_bounds = array<i64: 32, 64>}, {transform_indices = @transform_4, window_bounds = array<i64: 1, 128>}]} {
    %c0 = arith.constant 0 : index
    %c0_0 = arith.constant 0 : index
    %0 = vector.load %arg1[%c0, %c0_0] : memref<4x128xf32, #tpu.memory_space<vmem>>, vector<4x128xf32>
    %1 = vector.extract_strided_slice %0 {offsets = [3, 0], sizes = [1, 128], strides = [1, 1]} : vector<4x128xf32> to vector<1x128xf32>
    %cst = arith.constant 1.000000e+00 : f32
    %2 = vector.broadcast %cst : f32 to vector<1x128xf32>
    %3 = arith.subf %1, %2 : vector<1x128xf32>
    %4 = tpu.reciprocal %3 : vector<1x128xf32> -> vector<1x128xf32>
    %5 = vector.extract_strided_slice %0 {offsets = [0, 0], sizes = [1, 128], strides = [1, 1]} : vector<4x128xf32> to vector<1x128xf32>
    %6 = arith.mulf %5, %4 : vector<1x128xf32>
    %7 = vector.extract_strided_slice %0 {offsets = [1, 0], sizes = [1, 128], strides = [1, 1]} : vector<4x128xf32> to vector<1x128xf32>
    %8 = arith.mulf %7, %4 : vector<1x128xf32>
    %9 = vector.extract_strided_slice %0 {offsets = [2, 0], sizes = [1, 128], strides = [1, 1]} : vector<4x128xf32> to vector<1x128xf32>
    %cst_1 = arith.constant 1.000000e+00 : f32
    %10 = vector.broadcast %cst_1 : f32 to vector<1x128xf32>
    %11 = arith.subf %9, %10 : vector<1x128xf32>
    %12 = arith.mulf %11, %4 : vector<1x128xf32>
    %cst_2 = arith.constant 0.111111112 : f32
    %13 = vector.broadcast %cst_2 : f32 to vector<1x128xf32>
    %14 = arith.mulf %1, %13 : vector<1x128xf32>
    %c0_3 = arith.constant 0 : index
    %c0_4 = arith.constant 0 : index
    %15 = vector.load %arg2[%c0_3, %c0_4] : memref<128x9xf32, #tpu.memory_space<vmem>>, vector<128x9xf32>
    %16 = vector.extract_strided_slice %15 {offsets = [0, 0], sizes = [128, 1], strides = [1, 1]} : vector<128x9xf32> to vector<128x1xf32>
    %17 = vector.broadcast %16 : vector<128x1xf32> to vector<128x128xf32>
    %18 = vector.broadcast %6 : vector<1x128xf32> to vector<128x128xf32>
    %19 = arith.mulf %17, %18 : vector<128x128xf32>
    %20 = vector.extract_strided_slice %15 {offsets = [0, 1], sizes = [128, 1], strides = [1, 1]} : vector<128x9xf32> to vector<128x1xf32>
    %21 = vector.broadcast %20 : vector<128x1xf32> to vector<128x128xf32>
    %22 = vector.broadcast %8 : vector<1x128xf32> to vector<128x128xf32>
    %23 = arith.mulf %21, %22 : vector<128x128xf32>
    %24 = arith.addf %19, %23 : vector<128x128xf32>
    %25 = vector.extract_strided_slice %15 {offsets = [0, 2], sizes = [128, 1], strides = [1, 1]} : vector<128x9xf32> to vector<128x1xf32>
    %26 = vector.broadcast %25 : vector<128x1xf32> to vector<128x128xf32>
    %27 = vector.broadcast %12 : vector<1x128xf32> to vector<128x128xf32>
    %28 = arith.mulf %26, %27 : vector<128x128xf32>
    %29 = arith.addf %24, %28 : vector<128x128xf32>
    %30 = vector.extract_strided_slice %15 {offsets = [0, 3], sizes = [128, 1], strides = [1, 1]} : vector<128x9xf32> to vector<128x1xf32>
    %31 = vector.broadcast %30 : vector<128x1xf32> to vector<128x128xf32>
    %32 = vector.broadcast %14 : vector<1x128xf32> to vector<128x128xf32>
    %33 = arith.mulf %31, %32 : vector<128x128xf32>
    %34 = arith.addf %29, %33 : vector<128x128xf32>
    %35 = vector.extract_strided_slice %15 {offsets = [0, 4], sizes = [128, 1], strides = [1, 1]} : vector<128x9xf32> to vector<128x1xf32>
    %36 = vector.broadcast %35 : vector<128x1xf32> to vector<128x128xf32>
    %37 = arith.addf %34, %36 : vector<128x128xf32>
    %cst_5 = arith.constant 0.000000e+00 : f32
    %38 = vector.broadcast %cst_5 : f32 to vector<128x128xf32>
    %39 = arith.maximumf %37, %38 : vector<128x128xf32>
    %c0_6 = arith.constant 0 : index
    %c0_7 = arith.constant 0 : index
    %40 = vector.load %arg3[%c0_6, %c0_7] : memref<64x128xf32, #tpu.memory_space<vmem>>, vector<64x128xf32>
    %cst_8 = arith.constant dense<0.000000e+00> : vector<64x128xf32>
    %41 = tpu.matmul %40, %39, %cst_8 {dimension_numbers = #tpu.dot_dimension_numbers<[1], [0], [0], [1], [0, 0, 1, 1], [], []>} : vector<64x128xf32>, vector<128x128xf32>, vector<64x128xf32> -> vector<64x128xf32>
    %42 = vector.extract_strided_slice %15 {offsets = [0, 5], sizes = [64, 1], strides = [1, 1]} : vector<128x9xf32> to vector<64x1xf32>
    %43 = vector.broadcast %42 : vector<64x1xf32> to vector<64x128xf32>
    %44 = arith.addf %41, %43 : vector<64x128xf32>
    %cst_9 = arith.constant 0.000000e+00 : f32
    %45 = vector.broadcast %cst_9 : f32 to vector<64x128xf32>
    %46 = arith.maximumf %44, %45 : vector<64x128xf32>
    %c0_10 = arith.constant 0 : index
    %c0_11 = arith.constant 0 : index
    %47 = vector.load %arg4[%c0_10, %c0_11] : memref<32x64xf32, #tpu.memory_space<vmem>>, vector<32x64xf32>
    %cst_12 = arith.constant dense<0.000000e+00> : vector<32x128xf32>
    %48 = tpu.matmul %47, %46, %cst_12 {dimension_numbers = #tpu.dot_dimension_numbers<[1], [0], [0], [1], [0, 0, 1, 1], [], []>} : vector<32x64xf32>, vector<64x128xf32>, vector<32x128xf32> -> vector<32x128xf32>
    %49 = vector.extract_strided_slice %15 {offsets = [0, 6], sizes = [32, 1], strides = [1, 1]} : vector<128x9xf32> to vector<32x1xf32>
    %50 = vector.broadcast %49 : vector<32x1xf32> to vector<32x128xf32>
    %51 = arith.addf %48, %50 : vector<32x128xf32>
    %cst_13 = arith.constant 0.000000e+00 : f32
    %52 = vector.broadcast %cst_13 : f32 to vector<32x128xf32>
    %53 = arith.maximumf %51, %52 : vector<32x128xf32>
    %54 = vector.extract_strided_slice %15 {offsets = [0, 7], sizes = [32, 1], strides = [1, 1]} : vector<128x9xf32> to vector<32x1xf32>
    %55 = vector.broadcast %54 : vector<32x1xf32> to vector<32x128xf32>
    %56 = arith.mulf %53, %55 : vector<32x128xf32>
    %cst_14 = arith.constant dense<0.000000e+00> : vector<128xf32>
    %57 = vector.multi_reduction <add>, %56, %cst_14 [0] : vector<32x128xf32> to vector<128xf32>
    %58 = vector.shape_cast %57 : vector<128xf32> to vector<1x128xf32>
    %59 = vector.extract_strided_slice %15 {offsets = [0, 8], sizes = [1, 1], strides = [1, 1]} : vector<128x9xf32> to vector<1x1xf32>
    %60 = vector.broadcast %59 : vector<1x1xf32> to vector<1x128xf32>
    %61 = arith.addf %58, %60 : vector<1x128xf32>
    %62 = arith.negf %61 : vector<1x128xf32>
    %63 = math.exp %62 : vector<1x128xf32>
    %cst_15 = arith.constant 1.000000e+00 : f32
    %64 = vector.broadcast %cst_15 : f32 to vector<1x128xf32>
    %65 = arith.addf %64, %63 : vector<1x128xf32>
    %66 = arith.divf %64, %65 : vector<1x128xf32>
    %c0_16 = arith.constant 0 : index
    %c0_17 = arith.constant 0 : index
    %67 = vector.load %arg5[%c0_16, %c0_17] : memref<1x128xf32, #tpu.memory_space<vmem>>, vector<1x128xf32>
    tpu.vector_store %arg5[%c0_16, %c0_17], %66 {strides = array<i32>} : memref<1x128xf32, #tpu.memory_space<vmem>>, vector<1x128xf32>,
    return
  }
  func.func @transform_0(%arg0: i32) -> (i32, i32) {
    %c0_i32 = arith.constant 0 : i32
    %c0_i32_0 = arith.constant 0 : i32
    return %c0_i32, %arg0 : i32, i32
  }
  func.func @transform_1(%arg0: i32) -> (i32, i32) {
    %c0_i32 = arith.constant 0 : i32
    %c0_i32_0 = arith.constant 0 : i32
    %c0_i32_1 = arith.constant 0 : i32
    return %c0_i32, %c0_i32_0 : i32, i32
  }
  func.func @transform_2(%arg0: i32) -> (i32, i32) {
    %c0_i32 = arith.constant 0 : i32
    %c0_i32_0 = arith.constant 0 : i32
    %c0_i32_1 = arith.constant 0 : i32
    return %c0_i32, %c0_i32_0 : i32, i32
  }
  func.func @transform_3(%arg0: i32) -> (i32, i32) {
    %c0_i32 = arith.constant 0 : i32
    %c0_i32_0 = arith.constant 0 : i32
    %c0_i32_1 = arith.constant 0 : i32
    return %c0_i32, %c0_i32_0 : i32, i32
  }
  func.func @transform_4(%arg0: i32) -> (i32, i32) {
    %c0_i32 = arith.constant 0 : i32
    %c0_i32_0 = arith.constant 0 : i32
    return %c0_i32, %arg0 : i32, i32
  }
}

</mosaic_0001>

<bundles_post_ra>
// kernel: tpu_custom_call.1
= control target key start
LH: loop header
LB: loop body
LE: loop exit
PB: predicated region body
PF: predicated region fallthrough
CT: control target
= control target key end

     0   :  { %v1615_v2 = vmov 4   ;;  %v1122_v3 = vmov 1   ;;  %s1609_s0 = inlined_call_operand.vmem [shape: f32[4,128], index: 0, kind: input, shape index: {}]   ;;  %s1610_s1 = inlined_call_operand.vmem [shape: f32[128,9], index: 1, kind: input, shape index: {}]   ;;  %s1611_s2 = inlined_call_operand.vmem [shape: f32[64,128], index: 2, kind: input, shape index: {}]   ;;  %s1612_s3 = inlined_call_operand.vmem [shape: f32[32,64], index: 3, kind: input, shape index: {}]   ;;  %s1613_s4 = inlined_call_operand.hbm [shape: f32[1,128], index: 4, kind: output, shape index: {}]  }
   0x1   :  { %v1159_v0 = vld [vmem:[%s1610_s1 + $0x18] sm:$0xff]  ;;  %v1164_v1 = vld [vmem:[%s1610_s1] sm:$0xff]  ;;  %1055 = vset.pattern.permute.xlu0 %v1615_v2  ;;  %1040 = vset.pattern.permute.xlu1 %v1122_v3  ;;  %v1178_v5 = vld [vmem:[%s1610_s1 + $0x8] sm:$0xff] }
   0x2   :  { %461 = vperm.xlu0 %1055, %v1159_v0   ;;  %149 = vperm.xlu1 %1040, %v1164_v1   ;;  %v1173_v4 = vld [vmem:[%s1610_s1 + $0x20] sm:$0xff] }
   0x3   :  { %9 = vsyncpa [#allocation3], 0  ;;  %v1617_v6 = vmov 3   ;;  %v1614_v7 = vmov 2   ;;  %v1189_v8 = vld [vmem:[%s1610_s1 + $0x10] sm:$0xff]  ;;  %v1125_v9 = vmov 0   ;;  %v128_v49 = vlaneseq }
   0x4   :  { %v1199_v10 = vld [vmem:[%s1610_s1 + $0x48] sm:$0xff]  ;;  %v1206_v11 = vld [vmem:[%s1610_s1 + $0x50] sm:$0xff]  ;;  %v1223_v12 = vld [vmem:[%s1610_s1 + $0x38] sm:$0xff]  ;;  %vm717_vm0 = vcmask 523264  }
   0x5   :  { %v1228_v13 = vld [vmem:[%s1610_s1 + $0x28] sm:$0xff]  ;;  %v1235_v14 = vld [vmem:[%s1610_s1 + $0x40] sm:$0xff]  ;;  %v1250_v16 = vld [vmem:[%s1610_s1 + $0x70] sm:$0xff]  ;;  %v129_v53 = vshrl.u32 %v128_v49, 7 }
   0x6   :  { %465 = vperm.xlu0 %1055, %v1173_v4   ;;  %153 = vperm.xlu1 %1040, %v1178_v5   ;;  %v1243_v15 = vld [vmem:[%s1610_s1 + $0x68] sm:$0xff]  ;;  %v1266_v17 = vld [vmem:[%s1610_s1 + $0x78] sm:$0xff]  ;;  %v1271_v18 = vld [vmem:[%s1610_s1 + $0x30] sm:$0xff] }
   0x7   :  { %v1302_v19 = vld [vmem:[%s1610_s1 + $0x60] sm:$0xff]  ;;  %v1327_v24 = vld [vmem:[%s1610_s1 + $0x58] sm:$0xff]  ;;  %v130_v57 = vsub.s32 0, %v129_v53  ;;  %v214_v60 = vsub.s32 1, %v129_v53  ;;  %v314_v63 = vsub.s32 2, %v129_v53 }
   0x8   :  { %v18_v40 = vld [vmem:[%s1609_s0] sm:$0xf] }
   0x9   :  { %v874_v41 = vadd.f32 -1.0, %v18_v40 }
   0xa   :  { %1060 = vset.pattern.permute.xlu0 %v1617_v6  ;;  %1041 = vset.pattern.permute.xlu1 %v1614_v7 }
   0xb   :  { %349 = vperm.xlu0 %1060, %v1164_v1   ;;  %253 = vperm.xlu1 %1041, %v1178_v5   ;;  %1091 = vrcp.f32 %v874_v41 }
   0xf   :  { %361 = vperm.xlu0 %1060, %v1159_v0   ;;  %1042 = vset.pattern.permute.xlu1 %v1125_v9 }
  0x10   :  { %60 = vperm.xlu1 %1042, %v1189_v8  }
  0x13   :  { %365 = vperm.xlu0 %1060, %v1173_v4  }
  0x14   :  { %1043 = vset.pattern.permute.xlu1 %v1122_v3 }
  0x15   :  { %157 = vperm.xlu1 %1043, %v1189_v8   ;;  %v1092_v50 = vpop.eup %1091 }
  0x16   :  { %v22_v51 = vrot.slane %v1092_v50, 3  ;;  %v25_v54 = vrot.slane %v1092_v50, 2  ;;  %v28_v56 = vrot.slane %v1092_v50, 1 }
  0x17   :  { %385 = vperm.xlu0 %1060, %v1199_v10  }
  0x18   :  { %v24_v58 = vmul.f32 %v22_v51, %v18_v40  ;;  %v27_v61 = vmul.f32 %v25_v54, %v18_v40  ;;  %v31_v54 = vmul.f32 0.11111111, %v18_v40 }
  0x19   :  { %161 = vperm.xlu1 %1043, %v1159_v0  }
  0x1a   :  { %v1401_v49 = vrot.slane %v27_v61, %v214_v60 }
  0x1b   :  { %389 = vperm.xlu0 %1060, %v1206_v11  }
  0x1d   :  { %1044 = vset.pattern.permute.xlu1 %v1617_v6 }
  0x1e   :  { %353 = vperm.xlu1 %1044, %v1178_v5  }
  0x1f   :  { %1070 = vset.pattern.permute.xlu0 %v1125_v9 }
  0x20   :  { %50 = vperm.xlu0 %1070, %v1164_v1  }
  0x22   :  { %1045 = vset.pattern.permute.xlu1 %v1614_v7 }
  0x23   :  { %257 = vperm.xlu1 %1045, %v1189_v8  }
  0x24   :  { %55 = vperm.xlu0 %1070, %v1178_v5  }
  0x27   :  { %1046 = vset.pattern.permute.xlu1 %v1125_v9 }
  0x28   :  { %65 = vperm.xlu0 %1070, %v1159_v0   ;;  %70 = vperm.xlu1 %1046, %v1173_v4  }
  0x2c   :  { %85 = vperm.xlu0 %1070, %v1223_v12   ;;  %75 = vperm.xlu1 %1046, %v1228_v13  }
  0x30   :  { %90 = vperm.xlu0 %1070, %v1235_v14   ;;  %1047 = vset.pattern.permute.xlu1 %v1122_v3 }
  0x31   :  { %169 = vperm.xlu1 %1047, %v1228_v13  }
  0x34   :  { %115 = vperm.xlu0 %1070, %v1243_v15  }
  0x35   :  { %1048 = vset.pattern.permute.xlu1 %v1617_v6 }
  0x36   :  { %357 = vperm.xlu1 %1048, %v1189_v8  }
  0x38   :  { %120 = vperm.xlu0 %1070, %v1250_v16  }
  0x3a   :  { %1049 = vset.pattern.permute.xlu1 %v1615_v2 }
  0x3b   :  { %449 = vperm.xlu1 %1049, %v1164_v1  }
  0x3c   :  { %1074 = vset.pattern.permute.xlu0 %v1122_v3 }
  0x3d   :  { %165 = vperm.xlu0 %1074, %v1173_v4  }
  0x3f   :  { %453 = vperm.xlu1 %1049, %v1178_v5  }
  0x41   :  { %185 = vperm.xlu0 %1074, %v1199_v10  }
  0x43   :  { %1050 = vset.pattern.permute.xlu1 %v1614_v7 }
  0x44   :  { %269 = vperm.xlu1 %1050, %v1228_v13  }
  0x45   :  { %189 = vperm.xlu0 %1074, %v1206_v11  }
  0x48   :  { %1051 = vset.pattern.permute.xlu1 %v1125_v9 }
  0x49   :  { %209 = vperm.xlu0 %1074, %v1266_v17   ;;  %80 = vperm.xlu1 %1051, %v1271_v18  }
  0x4d   :  { %1077 = vset.pattern.permute.xlu0 %v1614_v7  ;;  %1052 = vset.pattern.permute.xlu1 %v1122_v3 }
  0x4e   :  { %249 = vperm.xlu0 %1077, %v1164_v1   ;;  %173 = vperm.xlu1 %1052, %v1271_v18  }
  0x52   :  { %261 = vperm.xlu0 %1077, %v1159_v0   ;;  %177 = vperm.xlu1 %1052, %v1223_v12  }
  0x56   :  { %265 = vperm.xlu0 %1077, %v1173_v4   ;;  %1053 = vset.pattern.permute.xlu1 %v1617_v6 }
  0x57   :  { %369 = vperm.xlu1 %1053, %v1228_v13  }
  0x5a   :  { %285 = vperm.xlu0 %1077, %v1199_v10  }
  0x5b   :  { %1054 = vset.pattern.permute.xlu1 %v1615_v2 }
  0x5c   :  { %457 = vperm.xlu1 %1054, %v1189_v8  }
  0x5e   :  { %289 = vperm.xlu0 %1077, %v1206_v11  }
  0x60   :  { %1056 = vset.pattern.permute.xlu1 %v1614_v7 }
  0x61   :  { %273 = vperm.xlu1 %1056, %v1271_v18  }
  0x62   :  { %309 = vperm.xlu0 %1077, %v1266_v17  }
  0x65   :  { %277 = vperm.xlu1 %1056, %v1223_v12  }
  0x66   :  { %1081 = vset.pattern.permute.xlu0 %v1615_v2 }
  0x67   :  { %485 = vperm.xlu0 %1081, %v1199_v10  }
  0x69   :  { %1057 = vset.pattern.permute.xlu1 %v1125_v9 }
  0x6a   :  { %95 = vperm.xlu1 %1057, %v1199_v10   ;;  %v30_v10 = vmul.f32 %v874_v41, %v28_v56 }
  0x6b   :  { %489 = vperm.xlu0 %1081, %v1206_v11  }
  0x6e   :  { %1058 = vset.pattern.permute.xlu1 %v1122_v3 }
  0x6f   :  { %181 = vperm.xlu1 %1058, %v1235_v14   ;;  %497 = vperm.xlu0 %1081, %v1302_v19  }
  0x73   :  { %1059 = vset.pattern.permute.xlu1 %v1617_v6  ;;  %509 = vperm.xlu0 %1081, %v1266_v17  }
  0x74   :  { %373 = vperm.xlu1 %1059, %v1271_v18  }
  0x78   :  { %377 = vperm.xlu1 %1059, %v1223_v12  }
  0x7c   :  { %1061 = vset.pattern.permute.xlu1 %v1615_v2 }
  0x7d   :  { %469 = vperm.xlu1 %1061, %v1228_v13  }
  0x81   :  { %1062 = vset.pattern.permute.xlu1 %v1614_v7  ;;  %v1313_v20 = vpop.permute.xlu1 %149  ;;  %v1315_v21 = vpop.permute.xlu0 %461 }
  0x82   :  { %281 = vperm.xlu1 %1062, %v1235_v14  }
  0x85   :  { %v1318_v22 = vpop.permute.xlu1 %153  ;;  %v1320_v23 = vpop.permute.xlu0 %465 }
  0x86   :  { %1063 = vset.pattern.permute.xlu1 %v1125_v9 }
  0x87   :  { %100 = vperm.xlu1 %1063, %v1206_v11   ;;  %v1397_v11 = vrot.slane %v24_v58, %v130_v57 }
  0x8a   :  { %v1329_v25 = vpop.permute.xlu1 %253  ;;  %v1331_v26 = vpop.permute.xlu0 %349 }
  0x8b   :  { %105 = vperm.xlu1 %1063, %v1327_v24  }
  0x8e   :  { %v1334_v27 = vpop.permute.xlu0 %361 }
  0x8f   :  { %1064 = vset.pattern.permute.xlu1 %v1122_v3  ;;  %v1337_v28 = vpop.permute.xlu1 %60 }
  0x90   :  { %193 = vperm.xlu1 %1064, %v1327_v24  }
  0x92   :  { %v1340_v29 = vpop.permute.xlu0 %365 }
  0x94   :  { %1065 = vset.pattern.permute.xlu1 %v1617_v6  ;;  %v1343_v30 = vpop.permute.xlu1 %157 }
  0x95   :  { %381 = vperm.xlu1 %1065, %v1235_v14  }
  0x96   :  { %v1346_v31 = vpop.permute.xlu0 %385 }
  0x98   :  { %v1348_v32 = vpop.permute.xlu1 %161 }
  0x99   :  { %1066 = vset.pattern.permute.xlu1 %v1615_v2 }
  0x9a   :  { %473 = vperm.xlu1 %1066, %v1271_v18   ;;  %v1352_v33 = vpop.permute.xlu0 %389 }
  0x9d   :  { %v1354_v34 = vpop.permute.xlu1 %353 }
  0x9e   :  { %477 = vperm.xlu1 %1066, %v1223_v12  }
  0x9f   :  { %v51_v35 = vpop.permute.xlu0 %50 }
  0xa0   :  { %v132_v40 = vmul.f32 %v1397_v11, %v51_v35 }
  0xa2   :  { %1067 = vset.pattern.permute.xlu1 %v1614_v7  ;;  %v1358_v36 = vpop.permute.xlu1 %257 }
  0xa3   :  { %v56_v37 = vpop.permute.xlu0 %55  ;;  %293 = vperm.xlu1 %1067, %v1327_v24  }
  0xa4   :  { %v133_v50 = vmul.f32 %v1397_v11, %v56_v37 }
  0xa7   :  { %v66_v38 = vpop.permute.xlu0 %65  ;;  %1068 = vset.pattern.permute.xlu1 %v1125_v9  ;;  %v1362_v39 = vpop.permute.xlu1 %70 }
  0xa8   :  { %110 = vperm.xlu1 %1068, %v1302_v19  }
  0xab   :  { %v1368_v42 = vpop.permute.xlu1 %75  ;;  %v1370_v43 = vpop.permute.xlu0 %85 }
  0xac   :  { %1069 = vset.pattern.permute.xlu1 %v1122_v3 }
  0xad   :  { %197 = vperm.xlu1 %1069, %v1302_v19  }
  0xaf   :  { %v1374_v44 = vpop.permute.xlu0 %90 }
  0xb0   :  { %v1376_v45 = vpop.permute.xlu1 %169 }
  0xb1   :  { %201 = vperm.xlu1 %1069, %v1243_v15  }
  0xb3   :  { %v1379_v46 = vpop.permute.xlu0 %115 }
  0xb5   :  { %1071 = vset.pattern.permute.xlu1 %v1617_v6  ;;  %v1382_v47 = vpop.permute.xlu1 %357  ;;  %v1409_v6 = vrot.slane %v30_v10, %v314_v63 }
  0xb6   :  { %393 = vperm.xlu1 %1071, %v1327_v24  }
  0xb7   :  { %v1385_v48 = vpop.permute.xlu0 %120  ;;  %v317_v37 = vmul.f32 %v1409_v6, %v1329_v25 }
  0xba   :  { %1072 = vset.pattern.permute.xlu1 %v1615_v2  ;;  %v1388_v52 = vpop.permute.xlu1 %449  ;;  %v217_v2 = vmul.f32 %v1401_v49, %v1318_v22  ;;  %v216_v22 = vmul.f32 %v1401_v49, %v1313_v20 }
  0xbb   :  { %481 = vperm.xlu1 %1072, %v1235_v14  }
  0xbc   :  { %v1391_v55 = vpop.permute.xlu0 %165  ;;  %v233_v41 = vadd.f32 %v217_v2, %v133_v50  ;;  %v232_v63 = vadd.f32 %v216_v22, %v132_v40 }
  0xbe   :  { %v454_v59 = vpop.permute.xlu1 %453 }
  0xbf   :  { %1073 = vset.pattern.permute.xlu1 %v1614_v7  ;;  %v414_v7 = vsub.s32 3, %v129_v53  ;;  %v333_v53 = vadd.f32 %v317_v37, %v233_v41 }
  0xc0   :  { %297 = vperm.xlu1 %1073, %v1302_v19   ;;  %v1395_v62 = vpop.permute.xlu0 %185 }
  0xc1   :  { %v1414_v58 = vrot.slane %v31_v54, %v414_v7  ;;  %v135_v7 = vmul.f32 %v1397_v11, %v66_v38  ;;  %v218_v54 = vmul.f32 %v1401_v49, %v1343_v30 }
  0xc3   :  { %v1399_v14 = vpop.permute.xlu1 %269  ;;  %v416_v2 = vmul.f32 %v1414_v58, %v1331_v26  ;;  %v219_v26 = vmul.f32 %v1401_v49, %v1348_v32 }
  0xc4   :  { %301 = vperm.xlu1 %1073, %v1243_v15   ;;  %v1405_v51 = vpop.permute.xlu0 %189 }
  0xc5   :  { %v235_v41 = vadd.f32 %v219_v26, %v135_v7  ;;  %v418_v7 = vmul.f32 %v1414_v58, %v1382_v47  ;;  %v1620_v26 = vmov 4  }
  0xc8   :  { %1075 = vset.pattern.permute.xlu1 %v1125_v9  ;;  %v81_v56 = vpop.permute.xlu1 %80  ;;  %v1412_v57 = vpop.permute.xlu0 %209  ;;  %v417_v9 = vmul.f32 %v1414_v58, %v1354_v34  ;;  %v139_v34 = vmul.f32 %v1397_v11, %v1370_v43  ;;  %v1619_v43 = vmov 3  }
  0xc9   :  { %125 = vperm.xlu1 %1075, %v1266_v17   ;;  %v138_v25 = vmul.f32 %v1397_v11, %v81_v56 }
  0xca   :  { %v433_v38 = vadd.f32 %v417_v9, %v333_v53  ;;  %v134_v53 = vmul.f32 %v1397_v11, %v1337_v28 }
  0xcc   :  { %v513_v40 = vadd.f32 %v454_v59, %v433_v38 }
  0xcd   :  { %v250_v60 = vpop.permute.xlu0 %249  ;;  %1076 = vset.pattern.permute.xlu1 %v1122_v3  ;;  %v174_v61 = vpop.permute.xlu1 %173  ;;  %v419_v3 = vmul.f32 %v1414_v58, %v1334_v27  ;;  %v318_v27 = vmul.f32 %v1409_v6, %v1358_v36 }
  0xce   :  { %v316_v35 = vmul.f32 %v1409_v6, %v250_v60  ;;  %v222_v20 = vmul.f32 %v1401_v49, %v174_v61  ;;  %205 = vperm.xlu1 %1076, %v1250_v16   ;;  %v529_v61 = vmax.f32 %v513_v40, 0.0 }
  0xd0   :  { %v332_v10 = vadd.f32 %v316_v35, %v232_v63  ;;  %v1436_v50 = vadd.f32 %v222_v20, %v138_v25 }
  0xd1   :  { %v262_v56 = vpop.permute.xlu0 %261  ;;  %v178_v37 = vpop.permute.xlu1 %177 }
  0xd2   :  { %v432_v22 = vadd.f32 %v416_v2, %v332_v10  ;;  %v319_v32 = vmul.f32 %v1409_v6, %v262_v56  ;;  %v223_v60 = vmul.f32 %v1401_v49, %v178_v37  ;;  %1078 = vset.pattern.permute.xlu1 %v1619_v43  ;;  %v234_v2 = vadd.f32 %v218_v54, %v134_v53 }
  0xd3   :  { %397 = vperm.xlu1 %1078, %v1302_v19   ;;  %v220_v53 = vmul.f32 %v1401_v49, %v1391_v55  ;;  %v420_v55 = vmul.f32 %v1414_v58, %v1340_v29  ;;  %v544_v29 = vld [vmem:[%s1611_s2] sm:$0xff] }
  0xd4   :  { %v335_v30 = vadd.f32 %v319_v32, %v235_v41  ;;  %v1450_v9 = vadd.f32 %v223_v60, %v139_v34  ;;  %v512_v59 = vadd.f32 %v1388_v52, %v432_v22  ;;  %v334_v28 = vadd.f32 %v318_v27, %v234_v2  ;;  %948 = vmatprep.mubr.f32.mxu0 %v544_v29 }
  0xd5   :  { %v425_v32 = vmul.f32 %v1414_v58, %v1346_v31 }
  0xd6   :  { %v435_v63 = vadd.f32 %v419_v3, %v335_v30  ;;  %v370_v25 = vpop.permute.xlu1 %369  ;;  %v528_v35 = vmax.f32 %v512_v59, 0.0  ;;  %v434_v20 = vadd.f32 %v418_v7, %v334_v28  ;;  %v1621_v3 = vmov 2  }
  0xd7   :  { %401 = vperm.xlu1 %1078, %v1243_v15   ;;  %v136_v30 = vmul.f32 %v1397_v11, %v1362_v39  ;;  %v221_v7 = vmul.f32 %v1401_v49, %v1376_v45 }
  0xd8   :  { %v982_v19 = vpack.c.bf16 %v529_v61, %v528_v35  ;;  %v515_v36 = vadd.f32 %v1315_v21, %v435_v63  ;;  %v266_v21 = vpop.permute.xlu0 %265  ;;  %v137_v63 = vmul.f32 %v1397_v11, %v1368_v42 }
  0xd9   :  { %v320_v59 = vmul.f32 %v1409_v6, %v266_v21  ;;  %v236_v2 = vadd.f32 %v220_v53, %v136_v30 }
  0xda   :  { %983 = vmatprep.subr.bf16.mxu0 %v982_v19  ;;  %v531_v38 = vmax.f32 %v515_v36, 0.0  ;;  %v237_v35 = vadd.f32 %v221_v7, %v137_v63 }
  0xdb   :  { %1079 = vset.pattern.permute.xlu1 %v1620_v26  ;;  %v458_v34 = vpop.permute.xlu1 %457  ;;  %985 = vmatpush3.bf16.msra.mxu0 %v982_v19  ;;  %v336_v61 = vadd.f32 %v320_v59, %v236_v2  ;;  %v421_v19 = vmul.f32 %v1414_v58, %v370_v25  ;;  %v226_v25 = vmul.f32 %v1401_v49, %v1405_v51 }
  0xdc   :  { %v514_v52 = vadd.f32 %v458_v34, %v434_v20  ;;  %493 = vperm.xlu1 %1079, %v1327_v24   ;;  %v225_v24 = vmul.f32 %v1401_v49, %v1395_v62  ;;  %v286_v56 = vpop.permute.xlu0 %285 }
  0xdd   :  { %v325_v40 = vmul.f32 %v1409_v6, %v286_v56  ;;  %v436_v28 = vadd.f32 %v420_v55, %v336_v61 }
  0xde   :  { %v530_v47 = vmax.f32 %v514_v52, 0.0 }
  0xe0   :  { %v986_v10 = vpack.c.bf16 %v531_v38, %v530_v47  ;;  %1080 = vset.pattern.permute.xlu1 %v1621_v3  ;;  %v1460_v54 = vpop.permute.xlu1 %273  ;;  %v290_v38 = vpop.permute.xlu0 %289 }
  0xe1   :  { %305 = vperm.xlu1 %1080, %v1250_v16   ;;  %v326_v3 = vmul.f32 %v1409_v6, %v290_v38 }
  0xe2   :  { %987 = vmatprep.subr.bf16.mxu0 %v986_v10 }
  0xe3   :  { %989 = vmatpush3.bf16.msra.mxu0 %v986_v10 }
  0xe4   :  { %v1463_v41 = vpop.permute.xlu1 %277 }
  0xe5   :  { %1082 = vset.pattern.permute.xlu1 %v1619_v43  ;;  %v140_v43 = vmul.f32 %v1397_v11, %v1374_v44 }
  0xe6   :  { %405 = vperm.xlu1 %1082, %v1250_v16  }
  0xe9   :  { %v96_v37 = vpop.permute.xlu1 %95 }
  0xea   :  { %v141_v22 = vmul.f32 %v1397_v11, %v96_v37  ;;  %409 = vperm.xlu1 %1082, %v1266_v17   ;;  %v1126_v37 = vmov 5  }
  0xeb   :  { %1085 = vset.pattern.permute.xlu0 %v1126_v37 }
  0xec   :  { %v241_v60 = vadd.f32 %v225_v24, %v141_v22  ;;  %557 = vperm.xlu0 %1085, %v1178_v5  }
  0xee   :  { %1083 = vset.pattern.permute.xlu1 %v1620_v26  ;;  %v182_v62 = vpop.permute.xlu1 %181  ;;  %v341_v27 = vadd.f32 %v325_v40, %v241_v60 }
  0xef   :  { %v224_v17 = vmul.f32 %v1401_v49, %v182_v62  ;;  %501 = vperm.xlu1 %1083, %v1243_v15   ;;  %v321_v15 = vmul.f32 %v1409_v6, %v1399_v14  ;;  %v323_v62 = vmul.f32 %v1409_v6, %v1463_v41 }
  0xf0   :  { %v1484_v31 = vadd.f32 %v425_v32, %v341_v27  ;;  %569 = vperm.xlu0 %1085, %v1173_v4  }
  0xf1   :  { %v1486_v44 = vadd.f32 %v224_v17, %v140_v43  ;;  %v337_v36 = vadd.f32 %v321_v15, %v237_v35  ;;  %v322_v43 = vmul.f32 %v1409_v6, %v1460_v54  ;;  %v339_v17 = vadd.f32 %v323_v62, %v1450_v9  ;;  %v310_v15 = vpop.permute.xlu0 %309 }
  0xf3   :  { %505 = vperm.xlu1 %1083, %v1250_v16   ;;  %v374_v39 = vpop.permute.xlu1 %373  ;;  %v437_v45 = vadd.f32 %v421_v19, %v337_v36  ;;  %v516_v16 = vadd.f32 %v1320_v23, %v436_v28  ;;  %v426_v23 = vmul.f32 %v1414_v58, %v1352_v33  ;;  %v338_v4 = vadd.f32 %v322_v43, %v1436_v50 }
  0xf4   :  { %577 = vperm.xlu0 %1085, %v1271_v18   ;;  %v422_v27 = vmul.f32 %v1414_v58, %v374_v39 }
  0xf5   :  { %v532_v42 = vmax.f32 %v516_v16, 0.0 }
  0xf6   :  { %v438_v2 = vadd.f32 %v422_v27, %v338_v4 }
  0xf7   :  { %v378_v20 = vpop.permute.xlu1 %377  ;;  %1084 = vset.pattern.permute.xlu1 %v1126_v37 }
  0xf8   :  { %553 = vperm.xlu1 %1084, %v1164_v1   ;;  %v423_v30 = vmul.f32 %v1414_v58, %v378_v20 }
  0xfa   :  { %v439_v54 = vadd.f32 %v423_v30, %v339_v17  ;;  %v145_v17 = vmul.f32 %v1397_v11, %v1379_v46 }
  0xfc   :  { %v470_v26 = vpop.permute.xlu1 %469  ;;  %561 = vperm.xlu1 %1084, %v1189_v8  }
  0xfd   :  { %v517_v34 = vadd.f32 %v470_v26, %v437_v45 }
  0xff   :  { %v533_v52 = vmax.f32 %v517_v34, 0.0 }
 0x100   :  { %565 = vperm.xlu1 %1084, %v1159_v0  }
 0x101   :  { %v990_v47 = vpack.c.bf16 %v533_v52, %v532_v42  ;;  %v282_v14 = vpop.permute.xlu1 %281 }
 0x102   :  { %v324_v28 = vmul.f32 %v1409_v6, %v282_v14 }
 0x103   :  { %991 = vmatprep.subr.bf16.mxu0 %v990_v47 }
 0x104   :  { %993 = vmatpush3.bf16.msra.mxu0 %v990_v47  ;;  %573 = vperm.xlu1 %1084, %v1228_v13   ;;  %v340_v20 = vadd.f32 %v324_v28, %v1486_v44 }
 0x106   :  { %v101_v10 = vpop.permute.xlu1 %100 }
 0x107   :  { %v142_v21 = vmul.f32 %v1397_v11, %v101_v10 }
 0x108   :  { %581 = vperm.xlu1 %1084, %v1223_v12   ;;  %v486_v12 = vpop.permute.xlu0 %485 }
 0x109   :  { %v242_v24 = vadd.f32 %v226_v25, %v142_v21  ;;  %v521_v36 = vadd.f32 %v486_v12, %v1484_v31 }
 0x10a   :  { %v106_v56 = vpop.permute.xlu1 %105 }
 0x10b   :  { %v342_v40 = vadd.f32 %v326_v3, %v242_v24  ;;  %v143_v32 = vmul.f32 %v1397_v11, %v106_v56  ;;  %v537_v26 = vmax.f32 %v521_v36, 0.0 }
 0x10c   :  { %v490_v21 = vpop.permute.xlu0 %489 }
 0x10d   :  { %v442_v51 = vadd.f32 %v426_v23, %v342_v40 }
 0x10f   :  { %v194_v22 = vpop.permute.xlu1 %193  ;;  %v522_v23 = vadd.f32 %v490_v21, %v442_v51  ;;  %v231_v51 = vmul.f32 %v1401_v49, %v1412_v57  ;;  %v551_v21 = vld [vmem:[%s1611_s2 + $0x38] sm:$0xff] }
 0x110   :  { %v227_v33 = vmul.f32 %v1401_v49, %v194_v22 }
 0x111   :  { %v538_v40 = vmax.f32 %v522_v23, 0.0  ;;  %v1127_v23 = vmov 6  }
 0x112   :  { %v243_v60 = vadd.f32 %v227_v33, %v143_v32  ;;  %1087 = vset.pattern.permute.xlu1 %v1127_v23  ;;  %1086 = vset.pattern.permute.xlu0 %v1127_v23 }
 0x113   :  { %706 = vperm.xlu1 %1087, %v1178_v5   ;;  %702 = vperm.xlu0 %1086, %v1164_v1  }
 0x114   :  { %v382_v53 = vpop.permute.xlu1 %381 }
 0x115   :  { %v424_v9 = vmul.f32 %v1414_v58, %v382_v53 }
 0x117   :  { %v440_v29 = vadd.f32 %v424_v9, %v340_v20  ;;  %710 = vperm.xlu1 %1087, %v1189_v8   ;;  %714 = vperm.xlu0 %1086, %v1159_v0  }
 0x119   :  { %v474_v59 = vpop.permute.xlu1 %473 }
 0x11a   :  { %v518_v18 = vadd.f32 %v474_v59, %v438_v2  ;;  %v331_v2 = vmul.f32 %v1409_v6, %v310_v15 }
 0x11c   :  { %v534_v61 = vmax.f32 %v518_v18, 0.0 }
 0x11d   :  { %v478_v55 = vpop.permute.xlu1 %477 }
 0x11e   :  { %v519_v7 = vadd.f32 %v478_v55, %v439_v54 }
 0x120   :  { %v535_v41 = vmax.f32 %v519_v7, 0.0 }
 0x122   :  { %v994_v63 = vpack.c.bf16 %v535_v41, %v534_v61  ;;  %v294_v39 = vpop.permute.xlu1 %293 }
 0x123   :  { %v327_v10 = vmul.f32 %v1409_v6, %v294_v39  ;;  %v146_v39 = vmul.f32 %v1397_v11, %v1385_v48 }
 0x124   :  { %995 = vmatprep.subr.bf16.mxu0 %v994_v63 }
 0x125   :  { %997 = vmatpush3.bf16.msra.mxu0 %v994_v63  ;;  %v343_v31 = vadd.f32 %v327_v10, %v243_v60  ;;  %v548_v10 = vld [vmem:[%s1611_s2 + $0x20] sm:$0xff] }
 0x127   :  { %v111_v13 = vpop.permute.xlu1 %110 }
 0x128   :  { %v144_v53 = vmul.f32 %v1397_v11, %v111_v13  ;;  %v498_v13 = vpop.permute.xlu0 %497 }
 0x12c   :  { %v198_v50 = vpop.permute.xlu1 %197 }
 0x12d   :  { %v228_v43 = vmul.f32 %v1401_v49, %v198_v50 }
 0x12f   :  { %v244_v60 = vadd.f32 %v228_v43, %v144_v53 }
 0x130   :  { %v202_v35 = vpop.permute.xlu1 %201 }
 0x131   :  { %v229_v4 = vmul.f32 %v1401_v49, %v202_v35 }
 0x133   :  { %v245_v61 = vadd.f32 %v229_v4, %v145_v17 }
 0x135   :  { %v394_v19 = vpop.permute.xlu1 %393 }
 0x136   :  { %v427_v3 = vmul.f32 %v1414_v58, %v394_v19 }
 0x138   :  { %v443_v24 = vadd.f32 %v427_v3, %v343_v31  ;;  %v549_v3 = vld [vmem:[%s1611_s2 + $0x28] sm:$0xff]  ;;  %v697_v31 = vld [vmem:[%s1612_s3] sm:$0xff] }
 0x139   :  { %976 = vmatprep.mubr.msk.f32.mxu1 %vm717_vm0, %v697_v31 }
 0x13a   :  { %v482_v45 = vpop.permute.xlu1 %481 }
 0x13b   :  { %v520_v16 = vadd.f32 %v482_v45, %v440_v29  ;;  %v510_v45 = vpop.permute.xlu0 %509 }
 0x13d   :  { %v536_v34 = vmax.f32 %v520_v16, 0.0 }
 0x13f   :  { %v998_v42 = vpack.c.bf16 %v537_v26, %v536_v34  ;;  %v298_v52 = vpop.permute.xlu1 %297 }
 0x140   :  { %v328_v62 = vmul.f32 %v1409_v6, %v298_v52 }
 0x141   :  { %999 = vmatprep.subr.bf16.mxu0 %v998_v42 }
 0x142   :  { %1001 = vmatpush3.bf16.msra.mxu0 %v998_v42  ;;  %v344_v18 = vadd.f32 %v328_v62, %v244_v60 }
 0x143   :  { %v302_v47 = vpop.permute.xlu1 %301 }
 0x144   :  { %v329_v54 = vmul.f32 %v1409_v6, %v302_v47 }
 0x146   :  { %v345_v46 = vadd.f32 %v329_v54, %v245_v61 }
 0x148   :  { %v126_v25 = vpop.permute.xlu1 %125 }
 0x149   :  { %v147_v27 = vmul.f32 %v1397_v11, %v126_v25 }
 0x14b   :  { %v247_v55 = vadd.f32 %v231_v51, %v147_v27 }
 0x14d   :  { %v206_v14 = vpop.permute.xlu1 %205  ;;  %v347_v35 = vadd.f32 %v331_v2, %v247_v55 }
 0x14e   :  { %v230_v7 = vmul.f32 %v1401_v49, %v206_v14  ;;  %v546_v14 = vld [vmem:[%s1611_s2 + $0x10] sm:$0xff] }
 0x150   :  { %v246_v28 = vadd.f32 %v230_v7, %v146_v39 }
 0x152   :  { %v398_v38 = vpop.permute.xlu1 %397 }
 0x153   :  { %v428_v30 = vmul.f32 %v1414_v58, %v398_v38  ;;  %v547_v38 = vld [vmem:[%s1611_s2 + $0x18] sm:$0xff] }
 0x155   :  { %v444_v41 = vadd.f32 %v428_v30, %v344_v18 }
 0x156   :  { %v402_v44 = vpop.permute.xlu1 %401 }
 0x157   :  { %v429_v57 = vmul.f32 %v1414_v58, %v402_v44  ;;  %v524_v9 = vadd.f32 %v498_v13, %v444_v41  ;;  %v550_v44 = vld [vmem:[%s1611_s2 + $0x30] sm:$0xff] }
 0x159   :  { %v445_v12 = vadd.f32 %v429_v57, %v345_v46  ;;  %v540_v16 = vmax.f32 %v524_v9, 0.0 }
 0x15b   :  { %v494_v56 = vpop.permute.xlu1 %493 }
 0x15c   :  { %v523_v37 = vadd.f32 %v494_v56, %v443_v24  ;;  %v1128_v24 = vmov 7   ;;  %v1129_v56 = vmov 8  }
 0x15d   :  { %1088 = vset.pattern.permute.xlu1 %v1128_v24  ;;  %1089 = vset.pattern.permute.xlu0 %v1128_v24 }
 0x15e   :  { %v539_v22 = vmax.f32 %v523_v37, 0.0  ;;  %820 = vperm.xlu1 %1088, %v1164_v1   ;;  %824 = vperm.xlu0 %1089, %v1178_v5  }
 0x160   :  { %v1002_v32 = vpack.c.bf16 %v539_v22, %v538_v40  ;;  %v306_v33 = vpop.permute.xlu1 %305 }
 0x161   :  { %v330_v15 = vmul.f32 %v1409_v6, %v306_v33 }
 0x162   :  { %1003 = vmatprep.subr.bf16.mxu0 %v1002_v32  ;;  %828 = vperm.xlu1 %1088, %v1189_v8  }
 0x163   :  { %1005 = vmatpush3.bf16.msra.mxu0 %v1002_v32  ;;  %v346_v36 = vadd.f32 %v330_v15, %v246_v28  ;;  %1090 = vset.pattern.permute.xlu0 %v1129_v56 }
 0x164   :  { %849 = vperm.xlu0 %1090, %v1164_v1  }
 0x165   :  { %v406_v59 = vpop.permute.xlu1 %405 }
 0x166   :  { %v430_v19 = vmul.f32 %v1414_v58, %v406_v59  ;;  %832 = vperm.xlu1 %1088, %v1159_v0  }
 0x168   :  { %v446_v11 = vadd.f32 %v430_v19, %v346_v36  ;;  %v698_v19 = vld [vmem:[%s1612_s3 + $0x8] sm:$0xff] }
 0x169   :  { %v410_v63 = vpop.permute.xlu1 %409 }
 0x16a   :  { %v431_v50 = vmul.f32 %v1414_v58, %v410_v63  ;;  %v545_v58 = vld [vmem:[%s1611_s2 + $0x8] sm:$0xff] }
 0x16b   :  { %v558_v22 = vpop.permute.xlu0 %557 }
 0x16c   :  { %v447_v49 = vadd.f32 %v431_v50, %v347_v35 }
 0x16e   :  { %v502_v20 = vpop.permute.xlu1 %501  ;;  %v527_v26 = vadd.f32 %v510_v45, %v447_v49  ;;  %v699_v49 = vld [vmem:[%s1612_s3 + $0x10] sm:$0xff] }
 0x16f   :  { %v525_v29 = vadd.f32 %v502_v20, %v445_v12  ;;  %v570_v17 = vpop.permute.xlu0 %569  ;;  %v700_v12 = vld [vmem:[%s1612_s3 + $0x18] sm:$0xff]  ;;  %s1130_s3 = smov [#allocation2]  }
 0x170   :  { %v543_v6 = vmax.f32 %v527_v26, 0.0  ;;  %s866_s18 = sshll.u32 %s1130_s3, 4  ;;  %s867_s18 = int_to_ptr.vmem [resolvable:$true] %s866_s18 }
 0x171   :  { %v541_v48 = vmax.f32 %v525_v29, 0.0  ;;  %s1097_s19 = scalar_lea.vmem %s867_s18, 16  ;;  %s1101_s20 = scalar_lea.vmem %s867_s18, 32 }
 0x172   :  { %v506_v34 = vpop.permute.xlu1 %505  ;;  %p1098_p0 = scmp.ne.s32.totalorder %s867_s18, %s1097_s19  ;;  %p1102_p1 = scmp.lt.s32.totalorder %s867_s18, %s867_s18 }
 0x173   :  { %v1006_v42 = vpack.c.bf16 %v541_v48, %v540_v16  ;;  %v526_v52 = vadd.f32 %v506_v34, %v446_v11  ;;  %v578_v39 = vpop.permute.xlu0 %577  ;;  %p1103_p2 = scmp.lt.s32.totalorder %s1101_s20, %s1097_s19 }
 0x175   :  { %v542_v47 = vmax.f32 %v526_v52, 0.0  ;;  %1007 = vmatprep.subr.bf16.mxu0 %v1006_v42  ;;  %p1104_p3 = por %p1103_p2, %p1102_p1 }
 0x176   :  { %1009 = vmatpush3.bf16.msra.mxu0 %v1006_v42 }
 0x177   :  { %v1010_v25 = vpack.c.bf16 %v543_v6, %v542_v47  ;;  %v554_v37 = vpop.permute.xlu1 %553  ;;  %p1105_p4 = pnand %p1104_p3, %p1098_p0 }
 0x179   :  { %1011 = vmatprep.subr.bf16.mxu0 %v1010_v25 }
 0x17a   :  { %1013 = vmatpush3.bf16.msra.mxu0 %v1010_v25 }
 0x17b   :  { %v562_v40 = vpop.permute.xlu1 %561 }
 0x17d   :  { %949 = vmatmul.mubr.f32.vlgmr.msra.gmra.mrb[0].mxu0 %v545_v58 }
 0x17e   :  { %951 = vmatprep.mubr.f32.mxu0 %v546_v14 }
 0x17f   :  { %v566_v32 = vpop.permute.xlu1 %565 }
 0x181   :  { %952 = vmatmul.mubr.f32.gmra.mrb[2].mxu0 %v547_v38 }
 0x182   :  { %954 = vmatprep.mubr.f32.mxu0 %v548_v10 }
 0x183   :  { %v574_v8 = vpop.permute.xlu1 %573 }
 0x185   :  { %955 = vmatmul.mubr.f32.gmra.mrb[4].mxu0 %v549_v3 }
 0x186   :  { %957 = vmatprep.mubr.f32.mxu0 %v550_v44 }
 0x187   :  { %v582_v41 = vpop.permute.xlu1 %581 }
 0x189   :  { %958 = vmatmul.mubr.f32.gmra.mrb[6].mxu0 %v551_v21 }
 0x192   :  { %v707_v20 = vpop.permute.xlu1 %706  ;;  %v703_v36 = vpop.permute.xlu0 %702 }
 0x196   :  { %v711_v29 = vpop.permute.xlu1 %710  ;;  %v715_v45 = vpop.permute.xlu0 %714 }
 0x1dd   :  { %v821_v16 = vpop.permute.xlu1 %820  ;;  %v825_v42 = vpop.permute.xlu0 %824 }
 0x1e1   :  { %v829_v25 = vpop.permute.xlu1 %828 }
 0x1e5   :  { %v833_v24 = vpop.permute.xlu1 %832 }
 0x250   :  { %v950_v33 = vpop.f32.mrb[0].mxu0 }
 0x251   :  { %v656_v43 = vadd.f32 %v950_v33, %v558_v22  ;;  %v650_v53 = vpop.f32.mrb[1].mxu0 }
 0x252   :  { %v651_v62 = vadd.f32 %v650_v53, %v554_v37 }
 0x253   :  { %v690_v27 = vmax.f32 %v656_v43, 0.0 }
 0x254   :  { %v689_v51 = vmax.f32 %v651_v62, 0.0  ;;  %v953_v60 = vpop.f32.mrb[2].mxu0  ;;  %v850_v62 = vpop.permute.xlu0 %849 }
 0x255   :  { %v666_v5 = vadd.f32 %v953_v60, %v566_v32  ;;  %v660_v4 = vpop.f32.mrb[3].mxu0 }
 0x256   :  { %v661_v30 = vadd.f32 %v660_v4, %v562_v40  ;;  %v1014_v59 = vpack.c.bf16 %v690_v27, %v689_v51 }
 0x257   :  { %v692_v1 = vmax.f32 %v666_v5, 0.0 }
 0x258   :  { %v691_v2 = vmax.f32 %v661_v30, 0.0  ;;  %v956_v0 = vpop.f32.mrb[4].mxu0  ;;  %1015 = vmatprep.subr.bf16.mxu1 %v1014_v59 }
 0x259   :  { %v676_v18 = vadd.f32 %v956_v0, %v574_v8  ;;  %v670_v54 = vpop.f32.mrb[5].mxu0  ;;  %1017 = vmatpush3.bf16.msra.mxu1 %v1014_v59 }
 0x25a   :  { %v1018_v55 = vpack.c.bf16 %v692_v1, %v691_v2  ;;  %v671_v7 = vadd.f32 %v670_v54, %v570_v17 }
 0x25b   :  { %v694_v61 = vmax.f32 %v676_v18, 0.0 }
 0x25c   :  { %v693_v57 = vmax.f32 %v671_v7, 0.0  ;;  %v959_v63 = vpop.f32.mrb[6].mxu0  ;;  %1019 = vmatprep.subr.bf16.mxu1 %v1018_v55 }
 0x25d   :  { %v686_v13 = vadd.f32 %v959_v63, %v582_v41  ;;  %v680_v50 = vpop.f32.mrb[7].mxu0  ;;  %1021 = vmatpush3.bf16.msra.mxu1 %v1018_v55 }
 0x25e   :  { %v1022_v46 = vpack.c.bf16 %v694_v61, %v693_v57  ;;  %v681_v15 = vadd.f32 %v680_v50, %v578_v39 }
 0x25f   :  { %v696_v35 = vmax.f32 %v686_v13, 0.0 }
 0x260   :  { %v695_v28 = vmax.f32 %v681_v15, 0.0  ;;  %1023 = vmatprep.subr.bf16.mxu1 %v1022_v46 }
 0x261   :  { %1025 = vmatpush3.bf16.msra.mxu1 %v1022_v46 }
 0x262   :  { %v1026_v9 = vpack.c.bf16 %v696_v35, %v695_v28 }
 0x264   :  { %1027 = vmatprep.subr.bf16.mxu1 %v1026_v9 }
 0x265   :  { %1029 = vmatpush3.bf16.msra.mxu1 %v1026_v9 }
 0x268   :  { %977 = vmatmul.mubr.msk.f32.vlgmr.msra.gmra.mrb[0].mxu1 %vm717_vm0, %v698_v19 }
 0x269   :  { %979 = vmatprep.mubr.msk.f32.mxu1 %vm717_vm0, %v699_v49 }
 0x26c   :  { %980 = vmatmul.mubr.msk.f32.gmra.mrb[2].mxu1 %vm717_vm0, %v700_v12 }
 0x33b   :  { %v978_v26 = vpop.f32.mrb[0].mxu1 }
 0x33c   :  { %v802_v48 = vadd.f32 %v978_v26, %v707_v20  ;;  %v796_v11 = vpop.f32.mrb[1].mxu1 }
 0x33d   :  { %v797_v34 = vadd.f32 %v796_v11, %v703_v36 }
 0x33e   :  { %v816_v52 = vmax.f32 %v802_v48, 0.0 }
 0x33f   :  { %v815_v47 = vmax.f32 %v797_v34, 0.0  ;;  %v981_v6 = vpop.f32.mrb[2].mxu1 }
 0x340   :  { %v836_v58 = vmul.f32 %v825_v42, %v816_v52  ;;  %v812_v14 = vadd.f32 %v981_v6, %v715_v45  ;;  %v806_v38 = vpop.f32.mrb[3].mxu1 }
 0x341   :  { %v835_v10 = vmul.f32 %v821_v16, %v815_v47  ;;  %v807_v3 = vadd.f32 %v806_v38, %v711_v29 }
 0x342   :  { %v818_v21 = vmax.f32 %v812_v14, 0.0 }
 0x343   :  { %v839_v44 = vadd.f32 %v836_v58, %v835_v10  ;;  %v817_v31 = vmax.f32 %v807_v3, 0.0 }
 0x344   :  { %v838_v56 = vmul.f32 %v833_v24, %v818_v21 }
 0x345   :  { %v837_v23 = vmul.f32 %v829_v25, %v817_v31 }
 0x347   :  { %v840_v37 = vadd.f32 %v839_v44, %v837_v23 }
 0x349   :  { %v841_v40 = vadd.f32 %v840_v37, %v838_v56 }
 0x34b   :  { %v842_v22 = vrot.slane %v841_v40, 4 }
 0x34d   :  { %v843_v32 = vadd.f32 %v842_v22, %v841_v40 }
 0x34f   :  { %v844_v33 = vrot.slane %v843_v32, 2 }
 0x351   :  { %v845_v43 = vadd.f32 %v844_v33, %v843_v32 }
 0x353   :  { %v846_v53 = vrot.slane %v845_v43, 1 }
 0x355   :  { %v847_v27 = vadd.f32 %v846_v53, %v845_v43 }
 0x357   :  { %v852_v51 = vadd.f32 %v850_v62, %v847_v27 }
 0x359   :  { %v879_v60 = vmul.f32 -1.442695, %v852_v51 }
 0x35b   :  { %1093 = vpow2.f32 %v879_v60 }
 0x365   :  { %v1094_v5 = vpop.eup %1093 }
 0x366   :  { %v856_v4 = vadd.f32 1.0, %v1094_v5 }
 0x368   :  { %1095 = vrcp.f32 %v856_v4 }
 0x372   :  { %v1096_v8 = vpop.eup %1095 }
 0x373   :  { %859 = vst [vmem:[#allocation2] sm:$0x1] %v1096_v8 }
 0x374   :  { %1108 = shalt.err (!%p1105_p4)
}
 0x375   :  { %s1109_s0 = scalar_lea.hbm %s1613_s4, 16 }
 0x376   :  { %p1110_p5 = scmp.ne.s32.totalorder %s1613_s4, %s1109_s0  ;;  %p1113_p6 = scmp.lt.u32.totalorder %s1109_s0, %s1613_s4 }
 0x378   :  { %p1115_p7 = pnand %p1113_p6, %p1110_p5 }
 0x37a   :  { %1118 = shalt.err (!%p1115_p7)
}
 0x37b   :  { %869 = dma.vmem_to_hbm [thread:$0]  %s867_s18, 16, %s1613_s4, [#allocation3]  }
 0x37c   :  { %1119 = dma.done.wait [#allocation3], 16  }
 0x37d   :  { %1120 = vsyncadd [#allocation3], 4294967280 }
 0x37e   :  { %873 = vsyncpa [#allocation3], 1 }

</bundles_post_ra>
